<compile_context>
chip_gen: v6e
topology: v6e:2x2x1
jax: 0.10.0
libtpu: 0.0.40
codegen_flags: <defaults>
</compile_context>

<pallas_src>
import functools
import math

import jax
import jax.numpy as jnp
from jax import lax
from jax.experimental import pallas as pl
from jax.experimental.pallas import tpu as pltpu

_NEG_LARGE = -1e30  # finite "minus infinity": exp() underflows to exactly 0.0
                    # (differs from -inf only for fully-masked rows, which a
                    # causal mask never produces)


def _attention_core(qh, kh, vh, o_ref, *, causal):
    """Shared scores -> softmax -> P@V.  qh/kh/vh are f32 [T, H] values."""
    t = qh.shape[0]

    # QK^T: contract the H axis of both operands via dot_general (no explicit
    # kh.T in the kernel source; Mosaic chooses the MXU feed).
    scores = lax.dot_general(
        qh.astype(jnp.bfloat16), kh.astype(jnp.bfloat16),
        dimension_numbers=(((1,), (1,)), ((), ())),
        preferred_element_type=jnp.float32)                      # [T, T] f32

    if causal:
        # In-kernel causal mask: two iota+compare VPU ops, no mask DMA.
        row = lax.broadcasted_iota(jnp.int32, (t, t), 0)
        col = lax.broadcasted_iota(jnp.int32, (t, t), 1)
        scores = jnp.where(col <= row, scores, _NEG_LARGE)

    # Numerically stable softmax over the last axis (f32 elementwise).
    row_max = jnp.max(scores, axis=-1, keepdims=True)
    exps = jnp.exp(scores - row_max)
    denom = jnp.sum(exps, axis=-1, keepdims=True)
    recip = pl.reciprocal(denom, approx=True)          # EUP slot
    recip = recip * (2.0 - denom * recip)              # one Newton step
    probs = exps * recip

    # Dropout: identity (eval mode).

    o_ref[...] = jnp.dot(probs.astype(jnp.bfloat16), vh.astype(jnp.bfloat16),
                         preferred_element_type=jnp.float32).astype(o_ref.dtype)


def _attention_head_fused_kernel(x_ref, w_ref, o_ref, *, inv_scale, head_size,
                                 causal):
    """Self-attention fast path: one [T,C] @ [C,3H] matmul for Q, K and V."""
    x = x_ref[...].astype(jnp.bfloat16)                          # [T, C]
    qkv = jnp.dot(x, w_ref[...], preferred_element_type=jnp.float32)  # [T, 3H]
    h = head_size
    qh = qkv[:, 0 * h:1 * h] * inv_scale   # fold 1/sqrt(H) into Q
    kh = qkv[:, 1 * h:2 * h]
    vh = qkv[:, 2 * h:3 * h]
    _attention_core(qh, kh, vh, o_ref, causal=causal)


def _attention_head_kernel(q_ref, k_ref, v_ref, w_ref, o_ref, *, inv_scale,
                           causal):
    """General (cross-attention) path: 3 dots, weights stacked in one input."""
    qh = jnp.dot(q_ref[...].astype(jnp.bfloat16), w_ref[0],
                 preferred_element_type=jnp.float32) * inv_scale
    kh = jnp.dot(k_ref[...].astype(jnp.bfloat16), w_ref[1],
                 preferred_element_type=jnp.float32)
    vh = jnp.dot(v_ref[...].astype(jnp.bfloat16), w_ref[2],
                 preferred_element_type=jnp.float32)
    _attention_core(qh, kh, vh, o_ref, causal=causal)


def attention_head(q, k, v, wq, wk, wv, *, causal=True, fuse_qkv=None):
    """Pallas forward of AttentionHead (eval mode).

    q, k, v   : [B, T, C] float32
    wq/wk/wv  : [C, H]  (transposed nn.Linear weights, no bias)
    causal    : True -> lower-triangular mask applied in-kernel.
                False -> mask=None in the PyTorch module.
    fuse_qkv  : force / forbid the fused self-attention path; by default it is
                auto-enabled when q, k, v are the same array object.
    Returns   : [B, T, H] float32
    """
    B, T, C = q.shape
    H = wq.shape[1]
    inv_scale = 1.0 / math.sqrt(float(H))

    if fuse_qkv is None:
        fuse_qkv = (q is k) and (k is v)

    # Wrapper-side reshape (free metadata op) so the kernel sees 2-D tiles.
    out_shape = jax.ShapeDtypeStruct((B * T, H), jnp.float32)
    grid = (B,)  # >=2 steps: pipelining on v5e/v6e, both TCs on v7x.
    compiler_params = pltpu.CompilerParams(dimension_semantics=("parallel",))

    if fuse_qkv:
        x2 = q.reshape(B * T, C)
        # Fused weight [C, 3H]: one MXU push instead of three, one BlockSpec.
        w_qkv = jnp.concatenate([wq, wk, wv], axis=1).astype(jnp.bfloat16)
        kernel = functools.partial(_attention_head_fused_kernel,
                                   inv_scale=inv_scale, head_size=H,
                                   causal=causal)
        out2 = pl.pallas_call(
            kernel,
            out_shape=out_shape,
            grid_spec=pltpu.PrefetchScalarGridSpec(
                num_scalar_prefetch=0,
                grid=grid,
                in_specs=[
                    pl.BlockSpec((T, C), lambda b: (b, 0)),        # x
                    pl.BlockSpec((C, 3 * H), lambda b: (0, 0)),    # W_qkv
                ],
                out_specs=pl.BlockSpec((T, H), lambda b: (b, 0)),
            ),
            compiler_params=compiler_params,
        )(x2, w_qkv)
    else:
        q2 = q.reshape(B * T, C)
        k2 = k.reshape(B * T, C)
        v2 = v.reshape(B * T, C)
        # Stacked weight [3, C, H]: one constant-index input instead of three.
        w_stk = jnp.stack([wq, wk, wv], axis=0).astype(jnp.bfloat16)
        kernel = functools.partial(_attention_head_kernel,
                                   inv_scale=inv_scale, causal=causal)
        out2 = pl.pallas_call(
            kernel,
            out_shape=out_shape,
            grid_spec=pltpu.PrefetchScalarGridSpec(
                num_scalar_prefetch=0,
                grid=grid,
                in_specs=[
                    pl.BlockSpec((T, C), lambda b: (b, 0)),        # q
                    pl.BlockSpec((T, C), lambda b: (b, 0)),        # k
                    pl.BlockSpec((T, C), lambda b: (b, 0)),        # v
                    pl.BlockSpec((3, C, H), lambda b: (0, 0, 0)),  # W stack
                ],
                out_specs=pl.BlockSpec((T, H), lambda b: (b, 0)),
            ),
            compiler_params=compiler_params,
        )(q2, k2, v2, w_stk)

    return out2.reshape(B, T, H)


def _reference(q, k, v, wq, wk, wv, mask):
    qh = q @ wq
    kh = k @ wk
    vh = v @ wv
    scores = jnp.einsum("btd,bsd->bts", qh, kh)
    scores = jnp.where(mask[None, :, :] != 0, scores, -jnp.inf)
    probs = jax.nn.softmax(scores / (qh.shape[-1] ** 0.5), axis=-1)
    return probs @ vh


if __name__ == "__main__":
    B, T, C, H = 2, 8, 32, 16

    key = jax.random.PRNGKey(0)
    kx, kq, kk, kv, kwq, kwk, kwv = jax.random.split(key, 7)

    # Kaiming-uniform-like init, stored pre-transposed as [C, H]
    # (PyTorch nn.Linear weight is [H, C]).
    bound = 1.0 / math.sqrt(C)
    wq = jax.random.uniform(kwq, (C, H), jnp.float32, -bound, bound)
    wk = jax.random.uniform(kwk, (C, H), jnp.float32, -bound, bound)
    wv = jax.random.uniform(kwv, (C, H), jnp.float32, -bound, bound)

    mask = jnp.tril(jnp.ones((T, T), dtype=jnp.int32))  # reference's causal mask

    # --- Self-attention (q = k = v): fused-QKV fast path.
    x = jax.random.normal(kx, (B, T, C), dtype=jnp.float32)
    out_self = jax.block_until_ready(
        attention_head(x, x, x, wq, wk, wv, causal=True))
    ref_self = _reference(x, x, x, wq, wk, wv, mask)
    assert out_self.shape == (B, T, H)
    assert jnp.allclose(out_self, ref_self, atol=3e-2, rtol=3e-2), \
        "fused self-attention mismatch vs reference"

    # --- Cross-attention (distinct q, k, v): general path.
    q = jax.random.normal(kq, (B, T, C), dtype=jnp.float32)
    k = jax.random.normal(kk, (B, T, C), dtype=jnp.float32)
    v = jax.random.normal(kv, (B, T, C), dtype=jnp.float32)
    out_x = jax.block_until_ready(
        attention_head(q, k, v, wq, wk, wv, causal=True))
    ref_x = _reference(q, k, v, wq, wk, wv, mask)
    assert out_x.shape == (B, T, H)
    assert jnp.allclose(out_x, ref_x, atol=3e-2, rtol=3e-2), \
        "cross-attention mismatch vs reference"

    print("KERNEL_OK")
</pallas_src>

<mosaic_0001>
module attributes {stable_mosaic.version = 11 : i64} {
  func.func @_attention_head_fused_kernel(%arg0: i32, %arg1: memref<8x32xf32, #tpu.memory_space<vmem>>, %arg2: memref<32x48xbf16, #tpu.memory_space<vmem>>, %arg3: memref<8x16xf32, #tpu.memory_space<vmem>>) attributes {dimension_semantics = [#tpu.dimension_semantics<parallel>], iteration_bounds = array<i64: 2>, scalar_prefetch = 0 : i64, scratch_operands = 0 : i64, tpu.core_type = #tpu.core_type<tc>, window_params = [{transform_indices = @transform_0, window_bounds = array<i64: 8, 32>}, {pipeline_mode = #tpu.pipeline_mode<synchronous>, transform_indices = @transform_1, window_bounds = array<i64: 32, 48>}, {transform_indices = @transform_2, window_bounds = array<i64: 8, 16>}]} {
    %c0 = arith.constant 0 : index
    %c0_0 = arith.constant 0 : index
    %0 = vector.load %arg1[%c0, %c0_0] : memref<8x32xf32, #tpu.memory_space<vmem>>, vector<8x32xf32>
    %1 = arith.truncf %0 : vector<8x32xf32> to vector<8x32xbf16>
    %c0_1 = arith.constant 0 : index
    %c0_2 = arith.constant 0 : index
    %2 = vector.load %arg2[%c0_1, %c0_2] : memref<32x48xbf16, #tpu.memory_space<vmem>>, vector<32x48xbf16>
    %cst = arith.constant dense<0.000000e+00> : vector<8x48xf32>
    %3 = tpu.matmul %1, %2, %cst {dimension_numbers = #tpu.dot_dimension_numbers<[1], [0], [0], [1], [0, 0, 1, 1], [], []>} : vector<8x32xbf16>, vector<32x48xbf16>, vector<8x48xf32> -> vector<8x48xf32>
    %4 = vector.extract_strided_slice %3 {offsets = [0, 0], sizes = [8, 16], strides = [1, 1]} : vector<8x48xf32> to vector<8x16xf32>
    %cst_3 = arith.constant 2.500000e-01 : f32
    %5 = vector.broadcast %cst_3 : f32 to vector<8x16xf32>
    %6 = arith.mulf %4, %5 : vector<8x16xf32>
    %7 = vector.extract_strided_slice %3 {offsets = [0, 16], sizes = [8, 16], strides = [1, 1]} : vector<8x48xf32> to vector<8x16xf32>
    %8 = vector.extract_strided_slice %3 {offsets = [0, 32], sizes = [8, 16], strides = [1, 1]} : vector<8x48xf32> to vector<8x16xf32>
    %9 = arith.truncf %6 : vector<8x16xf32> to vector<8x16xbf16>
    %10 = arith.truncf %7 : vector<8x16xf32> to vector<8x16xbf16>
    %cst_4 = arith.constant dense<0.000000e+00> : vector<8x8xf32>
    %11 = tpu.matmul %9, %10, %cst_4 {dimension_numbers = #tpu.dot_dimension_numbers<[1], [1], [0], [0], [0, 0, 1, 0], [], []>} : vector<8x16xbf16>, vector<8x16xbf16>, vector<8x8xf32> -> vector<8x8xf32>
    %12 = tpu.iota {dimensions = array<i32: 0>} : vector<8x8xi32>
    %13 = tpu.iota {dimensions = array<i32: 1>} : vector<8x8xi32>
    %14 = arith.cmpi sle, %13, %12 : vector<8x8xi32>
    %cst_5 = arith.constant -1.000000e+30 : f32
    %15 = vector.broadcast %cst_5 : f32 to vector<8x8xf32>
    %16 = arith.select %14, %11, %15 : vector<8x8xi1>, vector<8x8xf32>
    %cst_6 = arith.constant dense<0xFF800000> : vector<8xf32>
    %17 = vector.multi_reduction <maximumf>, %16, %cst_6 [1] : vector<8x8xf32> to vector<8xf32>
    %18 = vector.shape_cast %17 : vector<8xf32> to vector<8x1xf32>
    %19 = vector.broadcast %18 : vector<8x1xf32> to vector<8x8xf32>
    %20 = arith.subf %16, %19 : vector<8x8xf32>
    %21 = math.exp %20 : vector<8x8xf32>
    %cst_7 = arith.constant dense<0.000000e+00> : vector<8xf32>
    %22 = vector.multi_reduction <add>, %21, %cst_7 [1] : vector<8x8xf32> to vector<8xf32>
    %23 = vector.shape_cast %22 : vector<8xf32> to vector<8x1xf32>
    %24 = tpu.reciprocal %23 {approx = true} : vector<8x1xf32> -> vector<8x1xf32>
    %25 = arith.mulf %23, %24 : vector<8x1xf32>
    %cst_8 = arith.constant 2.000000e+00 : f32
    %26 = vector.broadcast %cst_8 : f32 to vector<8x1xf32>
    %27 = arith.subf %26, %25 : vector<8x1xf32>
    %28 = arith.mulf %24, %27 : vector<8x1xf32>
    %29 = vector.broadcast %28 : vector<8x1xf32> to vector<8x8xf32>
    %30 = arith.mulf %21, %29 : vector<8x8xf32>
    %31 = arith.truncf %30 : vector<8x8xf32> to vector<8x8xbf16>
    %32 = arith.truncf %8 : vector<8x16xf32> to vector<8x16xbf16>
    %cst_9 = arith.constant dense<0.000000e+00> : vector<8x16xf32>
    %33 = tpu.matmul %31, %32, %cst_9 {dimension_numbers = #tpu.dot_dimension_numbers<[1], [0], [0], [1], [0, 0, 1, 1], [], []>} : vector<8x8xbf16>, vector<8x16xbf16>, vector<8x16xf32> -> vector<8x16xf32>
    %c0_10 = arith.constant 0 : index
    %c0_11 = arith.constant 0 : index
    %34 = vector.load %arg3[%c0_10, %c0_11] : memref<8x16xf32, #tpu.memory_space<vmem>>, vector<8x16xf32>
    tpu.vector_store %arg3[%c0_10, %c0_11], %33 {strides = array<i32>} : memref<8x16xf32, #tpu.memory_space<vmem>>, vector<8x16xf32>,
    return
  }
  func.func @transform_0(%arg0: i32) -> (i32, i32) {
    %c0_i32 = arith.constant 0 : i32
    %c0_i32_0 = arith.constant 0 : i32
    return %arg0, %c0_i32 : i32, i32
  }
  func.func @transform_1(%arg0: i32) -> (i32, i32) {
    %c0_i32 = arith.constant 0 : i32
    %c0_i32_0 = arith.constant 0 : i32
    %c0_i32_1 = arith.constant 0 : i32
    return %c0_i32, %c0_i32_0 : i32, i32
  }
  func.func @transform_2(%arg0: i32) -> (i32, i32) {
    %c0_i32 = arith.constant 0 : i32
    %c0_i32_0 = arith.constant 0 : i32
    return %arg0, %c0_i32 : i32, i32
  }
}

</mosaic_0001>

<bundles_post_ra>
// kernel: tpu_custom_call.1
= control target key start
LH: loop header
LB: loop body
LE: loop exit
PB: predicated region body
PF: predicated region fallthrough
CT: control target
= control target key end

     0   :  { %7 = vsyncpa [#allocation3], 0  ;;  %s895_s0 = inlined_call_operand.hbm [shape: f32[16,32], index: 0, kind: input, shape index: {}]   ;;  %s896_s1 = inlined_call_operand.hbm [shape: bf16[32,48], index: 1, kind: input, shape index: {}]   ;;  %s897_s2 = inlined_call_operand.hbm [shape: f32[16,16], index: 2, kind: output, shape index: {}]  }
   0x1   :  { %9 = vsyncpa [#allocation3 + $0x1], 0 }
   0x2   :  { %10 = vsyncpa [#allocation6], 0 }
   0x3   :  { %11 = vsyncpa [#allocation4], 0 }
   0x4   :  { %13 = vsyncpa [#allocation4 + $0x1], 0  ;;  %s719_s9 = smov 0   ;;  %s721_s10 = smov 0  }
   0x5   :  { %s723_s11 = smov 0   ;;  %s725_s12 = smov 0  }
   0x6 LB: > { %s740_s13 = sadd.s32 4294967295, %s693_s12   ;;  %s456_s14 = sadd.s32 4294967294, %s693_s12   ;;  %s693_s12 = sphi %s725_s12, %s919_s12   ;;  %s689_s11 = sphi %s723_s11, %s918_s11   ;;  %s685_s10 = sphi %s721_s10, %s917_s10   ;;  %s681_s9 = sphi %s719_s9, %s916_s9  }
   0x7   : > { %p39_p0 = scmp.ne.s32.totalorder %s685_s10, %s681_s9  ;;  %p898_p1 = scmp.eq.s32.totalorder %s740_s13, 0 }
   0x8   : > { %p90_p3 = scmp.eq.s32.totalorder %s456_s14, 1  ;;  %p457_p5 = scmp.ge.s32.totalorder %s693_s12, 1 }
   0x9   : > { %p749_p4 = por %p898_p1, %p39_p0  ;;  %p97_p7 = scmp.lt.s32.totalorder %s693_s12, 3 }
   0xa   : > { %p754_p6 = por %p90_p3, %p39_p0  ;;  %s695_s18 = smov [#allocation5]  }
   0xb   : > { %s902_s15 = scalar_select %p749_p4, 1, 0 }
   0xc   : > { %s903_s16 = scalar_select %p754_p6, 1, 0 }
   0xd   : > { %p759_p8 = pnand %p457_p5, %p97_p7  ;;  %s109_s19 = sshll.u32 %s695_s18, 4  ;;  %s110_s19 = int_to_ptr.vmem [resolvable:$true] %s109_s19 }
   0xe   : > { %s773_s21 = sadd.s32 1, %s693_s12   ;;  %s26_s22 = sadd.s32 1, %s689_s11 }
   0xf   : > { %s904_s17 = scalar_select %p759_p8, 1, 0 }
  0x10   : > { %p510_p9 = pneg %p759_p8  ;;  %s23_s23 = ssub.s32 %s693_s12, %s773_s21 }
  0x11   : > { %s582_s24 = scalar_lea.vmem %s110_s19, 256  ;;  %p590_p5 = scmp.lt.s32.totalorder %s110_s19, %s110_s19 }
  0x12   : > { %p768_p11 = pnand %p510_p9, %p898_p1  ;;  %p583_p13 = scmp.ne.s32.totalorder %s110_s19, %s582_s24 }
  0x13   : > { %p591_p7 = scmp.lt.s32.totalorder %s582_s24, %s582_s24 }
  0x14   : > { %p573_p12 = pneg %p768_p11 }
  0x15   : > { %p592_p10 = por %p591_p7, %p590_p5 }
  0x16   : > { %p585_p0 = pnand %p583_p13, %p573_p12 }
  0x18   : > { %p586_p3 = pneg %p585_p0 }
  0x1a   : > { %p593_p2 = pnand %p592_p10, %p586_p3 }
  0x1c   : > { %596 = shalt.err (!%p593_p2)
}
  0x1d   : > { %s696_s25 = smov 64   ;;  %s697_s26 = smov 4  }
  0x1e   : > { %513 = dma.hbm_to_vmem [thread:$0]  (!%p768_p11), %s896_s1, 256, %s110_s19, [#allocation6], %s696_s25, %s696_s25, %s697_s26  }
  0x1f   : > { %p24_p9 = scmp.eq.s32.totalorder %s23_s23, 0  ;;  %p33_p12 = scmp.ne.s32.totalorder %s689_s11, %s685_s10 }
  0x20   : > { %p34_p10 = scmp.eq.s32.totalorder %s693_s12, 0  ;;  %p523_p2 = scmp.lt.s32.totalorder %s693_s12, 2 }
  0x21   : > { %s790_s29 = scalar_select %p24_p9, %s689_s11, %s26_s22  }
  0x22   : > { %p35_p13 = por %p34_p10, %p33_p12  ;;  %p906_p0 = scmp.eq.s32.totalorder %s740_s13, 1 }
  0x23   : > { %s123_s3 = sand.u32 1, %s689_s11   ;;  %s461_s4 = sshll.u32 %s693_s12, 7 }
  0x24   : > { %p794_p3 = por %p906_p0, %p33_p12  ;;  %s460_s5 = sshll.u32 %s123_s3, 3 }
  0x25   : > { %s803_s8 = scalar_lea.hbm %s895_s0, %s461_s4  ;;  %s127_s14 = scalar_lea.vmem [#allocation2], %s460_s5 }
  0x26   : > { %s907_s30 = scalar_select %p794_p3, 1, 0 }
  0x27   : > { %s134_s18 = sshll.u32 %s127_s14, 4  ;;  %p805_p11 = pnand %p523_p2, %p35_p13  ;;  %s135_s18 = int_to_ptr.vmem [resolvable:$true] %s134_s18 }
  0x28   : > { %s124_s20 = scalar_lea.sflag [#allocation3], %s123_s3  ;;  %s597_s22 = scalar_lea.hbm %s803_s8, 128 }
  0x29   : > { %p598_p5 = scmp.ne.s32.totalorder %s803_s8, %s597_s22  ;;  %p599_p7 = pneg %p805_p11 }
  0x2a   : > { %s602_s25 = scalar_lea.hbm %s895_s0, 256  ;;  %p603_p10 = scmp.lt.s32.totalorder %s803_s8, %s895_s0 }
  0x2b   : > { %p600_p9 = pnand %p599_p7, %p598_p5  ;;  %p604_p2 = scmp.lt.s32.totalorder %s602_s25, %s597_s22 }
  0x2d   : > { %p601_p12 = pneg %p600_p9  ;;  %p605_p13 = por %p604_p2, %p603_p10 }
  0x2f   : > { %p606_p0 = pnand %p605_p13, %p601_p12 }
  0x31   : > { %609 = shalt.err (!%p606_p0)
}
  0x32   : > { %s610_s28 = scalar_lea.vmem %s135_s18, 128  ;;  %s698_s3 = smov [#allocation2]  }
  0x33   : > { %p611_p1 = scmp.ne.s32.totalorder %s135_s18, %s610_s28  ;;  %s615_s4 = sshll.u32 %s698_s3, 4  ;;  %s616_s4 = int_to_ptr.vmem [resolvable:$false] %s615_s4 }
  0x34   : > { %s617_s5 = scalar_lea.vmem %s616_s4, 256  ;;  %p618_p5 = scmp.lt.s32.totalorder %s135_s18, %s616_s4 }
  0x35   : > { %p613_p6 = pnand %p611_p1, %p599_p7  ;;  %p619_p9 = scmp.lt.s32.totalorder %s617_s5, %s610_s28 }
  0x37   : > { %p614_p3 = pneg %p613_p6  ;;  %p620_p4 = por %p619_p9, %p618_p5 }
  0x39   : > { %p621_p8 = pnand %p620_p4, %p614_p3 }
  0x3b   : > { %624 = shalt.err (!%p621_p8)
}
  0x3c   : > { %517 = dma.hbm_to_vmem [thread:$0]  (!%p805_p11), %s803_s8, 128, %s135_s18, %s124_s20  }
  0x3d   : > { %p909_p12 = scmp.ne.s32.totalorder %s904_s17, 0 }
  0x3e   : > { %s826_s6 = sand.u32 (!%p909_p12), 1, %s685_s10   ;;  %p910_p1 = scmp.ne.s32.totalorder (!%p909_p12), %s902_s15, 0 }
  0x3f   : > { %143 = sbr.rel (%p909_p12) target bundleno = 1123 (0x463), region = 28  ;;  %s463_s7 = sshll.u32 (!%p909_p12), %s826_s6, 3 }
  0x40   : > { %s146_s14 = scalar_lea.sflag (!%p909_p12), [#allocation3], %s826_s6  ;;  %s149_s22 = scalar_lea.vmem (!%p909_p12), [#allocation2], %s463_s7 }
  0x44   : > { %668 = dma.done.wait (%p910_p1), %s146_s14, 128  }
  0x45   : > { %670 = vsyncadd (%p910_p1), %s146_s14, 4294967168  ;;  %p911_p4 = scmp.eq.s32.totalorder %s740_s13, 0 }
  0x47   : > { %672 = dma.done.wait (%p911_p4), [#allocation6], 256   ;;  %p912_p6 = pmov %p911_p4 }
  0x48   : > { %v699_v0 = vmov 0.0   ;;  %vm700_vm0 = vmmov 0   ;;  %v565_v1 = vld [vmem:[#allocation5 + $0x8] sm:$0xff]   ;;  %v566_v2 = vld [vmem:[#allocation5] sm:$0xff]   ;;  %v175_v3 = vld [vmem:[%s149_s22] sm:$0xff]  ;;  %vm193_vm1 = vcmask 261120   ;;  %v290_v14 = vlaneseq }
  0x49   : > { %674 = vsyncadd (%p912_p6), [#allocation6], 4294967040  ;;  %482 = vmatprep.subr.bf16.mxu0 %v699_v0  ;;  %486 = vmatprep.mubr.msk.bf16.mxu0 %vm700_vm0, %v699_v0  ;;  %v176_v4 = vpack.c.bf16 %v175_v3, %v175_v3  ;;  %s701_s15 = smov 112   ;;  %vm243_vm2 = vcmask 130048   ;;  %vm296_vm4 = vcmask 64512   ;;  %s702_s17 = smov 96  }
  0x4a   : > { %490 = vmatprep.subr.bf16.mxu1 %v699_v0  ;;  %492 = vmatprep.mubr.msk.bf16.mxu1 %vm700_vm0, %v699_v0  ;;  %v291_v15 = vshrl.u32 %v290_v14, 7  ;;  %v293_v16 = vand.u32 127, %v290_v14  ;;  %vm317_vm5 = vcmask 1043456   ;;  %s472_s8 = sshll.u32 %s740_s13, 7  ;;  %s173_s18 = scalar_lea.vmem [#allocation7], %s463_s7 }
  0x4b   : > { %483 = vmatpush3.bf16.msra.mxu0 %v565_v1  ;;  %s376_s19 = sshll.u32 %s173_s18, 4  ;;  %s851_s24 = scalar_lea.hbm %s897_s2, %s472_s8  ;;  %s853_s19 = int_to_ptr.vmem [resolvable:$true] %s376_s19 }
  0x4c   : > { %484 = vmatprep.subr.bf16.mxu0 %v699_v0  ;;  %vm294_vm3 = vcmp.le.s32.totalorder %v293_v16, %v291_v15  ;;  %s363_s25 = scalar_lea.sflag [#allocation4], %s826_s6  ;;  %s625_s26 = scalar_lea.vmem %s853_s19, 128 }
  0x4d   : > { %p626_p8 = scmp.ne.s32.totalorder %s853_s19, %s625_s26  ;;  %p913_p3 = scmp.ne.s32.totalorder %s907_s30, 0 }
  0x4e   : > { %s703_s13 = smov [#allocation7]  }
  0x4f   : > { %485 = vmatpush3.bf16.msra.mxu0 %v566_v2  ;;  %p627_p11 = pnand %p626_p8, %p913_p3  ;;  %s629_s27 = sshll.u32 %s703_s13, 4  ;;  %s630_s27 = int_to_ptr.vmem [resolvable:$false] %s629_s27 }
  0x50   : > { %496 = vmatprep.subr.bf16.mxu0 %v699_v0  ;;  %s631_s28 = scalar_lea.vmem %s630_s27, 256  ;;  %p632_p10 = scmp.lt.s32.totalorder %s853_s19, %s630_s27 }
  0x51   : > { %p628_p7 = pneg %p627_p11  ;;  %p633_p2 = scmp.lt.s32.totalorder %s631_s28, %s625_s26 }
  0x52   : > { %487 = vmatmul.mubr.msk.bf16.vlgmr.msra.gmra.mxu0 %vm193_vm1, %v176_v4 }
  0x53   : > { %498 = vmatprep.mubr.msk.bf16.mxu0 %vm700_vm0, %v699_v0  ;;  %p634_p13 = por %p633_p2, %p632_p10 }
  0x55   : > { %p635_p0 = pnand %p634_p13, %p628_p7 }
 0x112   : > { %v231_v5 = vpop.f32.mrf.mxu0 }
 0x113   : > { %v239_v6 = vpack.c.bf16 %v231_v5, %v231_v5  ;;  %v237_v12 = vmul.f32 0.25, %v231_v5 }
 0x114   : > { %v488_v7 = vpop.f32.mrf.mxu0 }
 0x115   : > { %241 = vrot.lane.b32.xlu0 %v239_v6, %s701_s15  ;;  %v238_v13 = vpack.c.bf16 %v237_v12, %v237_v12 }
 0x116   : > { %v234_v8 = vpop.f32.mrf.mxu0 }
 0x118   : > { %v489_v9 = vpop.f32.mrf.mxu0 }
 0x187   : > { %v242_v10 = vpop.permute.xlu0 %241 }
 0x188   : > { %v248_v11 = vsel %vm243_vm2, %v242_v10, 0 }
 0x189   : > { %491 = vmatpush3.bf16.xpose.msra.mxu1 %v248_v11 }
 0x190   : > { %493 = vmatmul.mubr.msk.bf16.vlgmr.msra.gmra.mxu1 %vm243_vm2, %v238_v13 }
 0x250   : > { %v284_v17 = vpop.f32.mrf.mxu1 }
 0x251   : > { %v295_v18 = vsel %vm294_vm3, %v284_v17, -1e+30 }
 0x252   : > { %v494_v19 = vpop.f32.mrf.mxu1  ;;  %v297_v20 = vsel %vm296_vm4, %v295_v18, -inf }
 0x253   : > { %298 = vmax.xlane.f32.xlu0 %v297_v20 }
 0x254   : > { %v287_v21 = vpop.f32.mrf.mxu1 }
 0x256   : > { %v495_v22 = vpop.f32.mrf.mxu1 }
 0x2dc   : > { %v299_v23 = vpop.xlane.xlu0 %298 }
 0x2dd   : > { %v300_v24 = vsub.f32 %v295_v18, %v299_v23 }
 0x2df   : > { %v301_v25 = vmul.f32 1.442695, %v300_v24 }
 0x2e1   : > { %567 = vpow2.f32 %v301_v25 }
 0x2ee   : > { %v568_v26 = vpop.eup %567 }
 0x2ef   : > { %v303_v27 = vsel %vm296_vm4, %v568_v26, 0.0 }
 0x2f0   : > { %304 = vadd.xlane.f32.xlu1 %v303_v27 }
 0x301   : > { %312 = vrot.lane.b32.xlu1 %v239_v6, %s702_s17 }
 0x379   : > { %v305_v28 = vpop.xlane.xlu1 %304 }
 0x37a   : > { %569 = vrcp.f32 %v305_v28 }
 0x37d   : > { %v313_v29 = vpop.permute.xlu1 %312 }
 0x37e   : > { %v319_v30 = vsel %vm317_vm5, %v313_v29, 0 }
 0x37f   : > { %497 = vmatpush3.bf16.msra.mxu0 %v319_v30 }
 0x387   : > { %v570_v31 = vpop.eup %569 }
 0x388   : > { %v307_v32 = vmul.f32 %v570_v31, %v305_v28 }
 0x38a   : > { %v308_v33 = vsub.f32 2.0, %v307_v32 }
 0x38c   : > { %v309_v34 = vmul.f32 %v570_v31, %v308_v33 }
 0x38e   : > { %v310_v35 = vmul.f32 %v568_v26, %v309_v34 }
 0x390   : > { %v311_v36 = vpack.c.bf16 %v310_v35, %v310_v35 }
 0x392   : > { %499 = vmatmul.mubr.msk.bf16.vlgmr.msra.gmra.mxu0 %vm296_vm4, %v311_v36 }
 0x452   : > { %v355_v37 = vpop.f32.mrf.mxu0 }
 0x453   : > { %361 = vst.msk [vmem:[%s173_s18] sm:$0xff] %vm243_vm2, %v355_v37 }
 0x454   : > { %v500_v38 = vpop.f32.mrf.mxu0 }
 0x455   : > { %638 = shalt.err (!%p635_p0)
}
 0x456   : > { %s639_s3 = scalar_lea.hbm %s851_s24, 128  ;;  %s643_s6 = scalar_lea.hbm %s897_s2, 256 }
 0x457   : > { %p640_p5 = scmp.ne.s32.totalorder %s851_s24, %s639_s3  ;;  %p644_p1 = scmp.lt.s32.totalorder %s851_s24, %s897_s2 }
 0x458   : > { %p645_p4 = scmp.lt.s32.totalorder %s643_s6, %s639_s3 }
 0x459   : > { %p641_p9 = pnand %p640_p5, %p913_p3 }
 0x45a   : > { %p646_p6 = por %p645_p4, %p644_p1 }
 0x45b   : > { %p642_p12 = pneg %p641_p9 }
 0x45d   : > { %p647_p8 = pnand %p646_p6, %p642_p12 }
 0x45f   : > { %650 = shalt.err (!%p647_p8)
}
 0x460   : > { %508 = dma.vmem_to_hbm [thread:$0]  (%p913_p3), %s853_s19, 128, %s851_s24, %s363_s25   ;;  %v358_v39 = vpop.f32.mrf.mxu0 }
 0x462   : > { %v501_v40 = vpop.f32.mrf.mxu0 }
 0x463 PF: > { %s388_s22 = sand.u32 1, %s681_s9   ;;  %p914_p11 = scmp.ne.s32.totalorder %s903_s16, 0 }
 0x464   : > { %p915_p7 = scmp.ge.s32.totalorder %s693_s12, 2  ;;  %s389_s15 = scalar_lea.sflag [#allocation4], %s388_s22 }
 0x466   : > { %p519_p10 = pnand %p915_p7, %p914_p11 }
 0x468   : > { %p520_p2 = pneg %p519_p10 }
 0x46a   : > { %676 = dma.done.wait (%p520_p2), %s389_s15, 128  }
 0x46b   : > { %678 = vsyncadd (%p520_p2), %s389_s15, 4294967168  ;;  %p16_p3 = scmp.ge.s32.totalorder %s773_s21, 4   ;;  %s916_s9 = smov %s685_s10 }
 0x46c   : > { %s917_s10 = smov %s689_s11  ;;  %s918_s11 = smov %s790_s29 }
 0x46d   : > { %s919_s12 = smov %s773_s21  ;;  %18 = sbr.rel (!%p16_p3) target bundleno = 6 (0x6), region = 77 }
 0x472   :  { %394 = vsyncpa [#allocation3], 1 }
 0x473   :  { %396 = vsyncpa [#allocation3 + $0x1], 1 }
 0x474   :  { %397 = vsyncpa [#allocation6], 1 }
 0x475   :  { %398 = vsyncpa [#allocation4], 1 }
 0x476   :  { %400 = vsyncpa [#allocation4 + $0x1], 1 }

</bundles_post_ra>
